<compile_context>
chip_gen: v6e
topology: v6e:2x2x1
jax: 0.10.0
libtpu: 0.0.40
codegen_flags: <defaults>
</compile_context>

<pallas_src>
import jax
import jax.numpy as jnp
from jax.experimental import pallas as pl
from jax.experimental.pallas import tpu as pltpu


def _mha_kernel(x_ref, wqkv_ref, bqkv_ref, wc_ref, bc_ref, o_ref, acc_ref):
    """Grid = (batch, head). One head of one batch element per step.

    The head axis is a reduction ("arbitrary"): each step accumulates this
    head's slice of  concat(heads) @ W_concat^T  into the (S, E) f32 scratch;
    the final head adds b_concat and stores the batch element's output tile.
    """
    h = pl.program_id(1)
    last_h = pl.num_programs(1) - 1

    @pl.when(h == 0)
    def _():
        acc_ref[...] = jnp.zeros_like(acc_ref)

    x = x_ref[0, 0]                                   # (S, D) bf16

    # Per-head Q/K/V projections.  Leading qkv axis -> free static index, no
    # lane-dim slicing.  1/sqrt(D) is already folded into Wq / bq.
    q = (jnp.dot(x, wqkv_ref[0, 0], preferred_element_type=jnp.float32)
         + bqkv_ref[0, 0]).astype(jnp.bfloat16)       # (S, D)
    k = (jnp.dot(x, wqkv_ref[1, 0], preferred_element_type=jnp.float32)
         + bqkv_ref[1, 0]).astype(jnp.bfloat16)       # (S, D)
    v = (jnp.dot(x, wqkv_ref[2, 0], preferred_element_type=jnp.float32)
         + bqkv_ref[2, 0]).astype(jnp.bfloat16)       # (S, D)

    # Attention scores for this head only -> (S, S) f32 (bounded VMEM).
    scores = jnp.einsum('qd,kd->qk', q, k, preferred_element_type=jnp.float32)
    m = jnp.max(scores, axis=-1, keepdims=True)
    p = jnp.exp(scores - m)
    l = jnp.sum(p, axis=-1, keepdims=True)

    # Unnormalized PV matmul, then normalize with an approx reciprocal (EUP).
    hv = jnp.dot(p.astype(jnp.bfloat16), v, preferred_element_type=jnp.float32)
    hv = hv * pl.reciprocal(l, approx=True)           # (S, D) f32

    # concat(heads) @ Wc^T  ==  sum_h  hv_h @ Wc^T[h*D:(h+1)*D, :]
    # accumulated across the head grid axis (no (H, S, E) intermediate).
    acc_ref[...] += jnp.dot(hv.astype(jnp.bfloat16), wc_ref[0],
                            preferred_element_type=jnp.float32)

    @pl.when(h == last_h)
    def _():
        o_ref[0] = (acc_ref[...] + bc_ref[...]).astype(o_ref.dtype)


def pack_params(params, num_head):
    """One-time packing of PyTorch-layout parameters (hoisted out of forward)."""
    wq, bq, wk, bk, wv, bv, wc, bc = params
    H = num_head
    D = wq.shape[-1]
    E = wc.shape[0]
    scale = 1.0 / (D ** 0.5)
    # y = x @ W^T + b, leading qkv axis, 1/sqrt(D) folded into the Q weights/bias.
    wqkv = jnp.stack(
        [jnp.swapaxes(wq, 1, 2) * scale,
         jnp.swapaxes(wk, 1, 2),
         jnp.swapaxes(wv, 1, 2)], axis=0).astype(jnp.bfloat16)          # (3, H, D, D)
    bqkv = jnp.stack([bq * scale, bk, bv], axis=0).astype(jnp.float32)   # (3, H, D)
    bqkv = bqkv.reshape(3, H, 1, D)                                      # (3, H, 1, D)
    wc_heads = wc.T.reshape(H, D, E).astype(jnp.bfloat16)                # (H, D, E)
    bc2 = bc.reshape(1, E).astype(jnp.float32)                           # (1, E)
    return wqkv, bqkv, wc_heads, bc2


def multihead_attention(x, packed_params, num_head, *, out_dtype=jnp.float32):
    """Pallas TPU forward pass matching the PyTorch MultiheadAttention module."""
    wqkv, bqkv, wc_heads, bc2 = packed_params
    B, S, E = x.shape
    H = num_head
    D = E // H

    # Per-head split of the activations; bf16 halves the activation DMA traffic.
    x_heads = x.reshape(B, S, H, D).transpose(0, 2, 1, 3).astype(jnp.bfloat16)

    # Explicit VMEM budget: per-step working set + double-buffered input blocks,
    # with headroom, clamped to [32 MiB, 64 MiB] (v7x physical VMEM is 64 MiB).
    f32, bf16 = 4, 2
    per_step = (2 * S * S * f32                    # scores + p
                + 3 * S * D * (f32 + bf16)         # q/k/v (f32 accum + bf16 copies)
                + S * D * f32                      # hv
                + 2 * S * E * f32)                 # accumulator + output block
    blocks = 2 * (S * D * bf16 + 3 * D * D * bf16 + 3 * D * f32
                  + D * E * bf16 + E * f32)        # double-buffered input blocks
    vmem_limit = int(min(max(4 * (per_step + blocks), 32 * 1024 * 1024),
                         64 * 1024 * 1024))

    grid_spec = pltpu.PrefetchScalarGridSpec(
        num_scalar_prefetch=0,
        grid=(B, H),                               # batch parallel, head = reduction
        in_specs=[
            pl.BlockSpec((1, 1, S, D), lambda b, h: (b, h, 0, 0)),  # x (head h of batch b)
            pl.BlockSpec((3, 1, D, D), lambda b, h: (0, h, 0, 0)),  # Wq/Wk/Wv (head h)
            pl.BlockSpec((3, 1, 1, D), lambda b, h: (0, h, 0, 0)),  # bq/bk/bv (head h)
            pl.BlockSpec((1, D, E),    lambda b, h: (h, 0, 0)),     # W_concat^T rows of head h
            pl.BlockSpec((1, E),       lambda b, h: (0, 0)),        # b_concat
        ],
        out_specs=pl.BlockSpec((1, S, E), lambda b, h: (b, 0, 0)),
        scratch_shapes=[pltpu.VMEM((S, E), jnp.float32)],
    )

    return pl.pallas_call(
        _mha_kernel,
        out_shape=jax.ShapeDtypeStruct((B, S, E), out_dtype),
        grid_spec=grid_spec,
        compiler_params=pltpu.CompilerParams(
            dimension_semantics=("parallel", "arbitrary"),
            vmem_limit_bytes=vmem_limit),
    )(x_heads, wqkv, bqkv, wc_heads, bc2)


def mha_reference(x, params, num_head):
    """Pure-JAX f32 reference mirroring the PyTorch forward pass."""
    wq, bq, wk, bk, wv, bv, wc, bc = params
    B, S, E = x.shape
    D = E // num_head
    xh = x.reshape(B, S, num_head, D)
    heads = []
    for h in range(num_head):
        hs = xh[:, :, h, :]
        q = hs @ wq[h].T + bq[h]
        k = hs @ wk[h].T + bk[h]
        v = hs @ wv[h].T + bv[h]
        s = jax.nn.softmax(q @ jnp.swapaxes(k, 1, 2) / (D ** 0.5), axis=-1)
        heads.append(s @ v)
    cat = jnp.concatenate(heads, axis=-1)
    return cat @ wc.T + bc


def init_params(key, embed_dim, num_head):
    """Deterministic init matching the shapes of the PyTorch module."""
    D = embed_dim // num_head
    bound_h = 1.0 / (D ** 0.5)
    bound_e = 1.0 / (embed_dim ** 0.5)
    ks = jax.random.split(key, 8)
    wq = jax.random.uniform(ks[0], (num_head, D, D), jnp.float32, -bound_h, bound_h)
    bq = jax.random.uniform(ks[1], (num_head, D), jnp.float32, -bound_h, bound_h)
    wk = jax.random.uniform(ks[2], (num_head, D, D), jnp.float32, -bound_h, bound_h)
    bk = jax.random.uniform(ks[3], (num_head, D), jnp.float32, -bound_h, bound_h)
    wv = jax.random.uniform(ks[4], (num_head, D, D), jnp.float32, -bound_h, bound_h)
    bv = jax.random.uniform(ks[5], (num_head, D), jnp.float32, -bound_h, bound_h)
    wc = jax.random.uniform(ks[6], (embed_dim, embed_dim), jnp.float32, -bound_e, bound_e)
    bc = jax.random.uniform(ks[7], (embed_dim,), jnp.float32, -bound_e, bound_e)
    return (wq, bq, wk, bk, wv, bv, wc, bc)


if __name__ == "__main__":
    batch, seq_len, embed_dim, num_head = 2, 8, 32, 4

    key = jax.random.PRNGKey(0)
    k_x, k_p = jax.random.split(key)
    x = jax.random.normal(k_x, (batch, seq_len, embed_dim), jnp.float32)
    params = init_params(k_p, embed_dim, num_head)

    packed = pack_params(params, num_head)     # one-time packing, outside forward path
    out = multihead_attention(x, packed, num_head)
    out = jax.block_until_ready(out)

    ref = mha_reference(x, params, num_head)
    assert out.shape == (batch, seq_len, embed_dim)
    # bf16 MXU operands + approx reciprocal vs. a pure-f32 reference.
    assert jnp.allclose(out, ref, atol=5e-2, rtol=5e-2), (
        f"mismatch vs reference, max |diff| = {jnp.max(jnp.abs(out - ref))}")

    print("KERNEL_OK")
</pallas_src>

<mosaic_0001>
module attributes {stable_mosaic.version = 11 : i64} {
  func.func @_mha_kernel(%arg0: i32, %arg1: i32, %arg2: memref<1x1x8x8xbf16, #tpu.memory_space<vmem>>, %arg3: memref<3x1x8x8xbf16, #tpu.memory_space<vmem>>, %arg4: memref<3x1x1x8xf32, #tpu.memory_space<vmem>>, %arg5: memref<1x8x32xbf16, #tpu.memory_space<vmem>>, %arg6: memref<1x32xf32, #tpu.memory_space<vmem>>, %arg7: memref<1x8x32xf32, #tpu.memory_space<vmem>>, %arg8: memref<8x32xf32, #tpu.memory_space<vmem>>) attributes {dimension_semantics = [#tpu.dimension_semantics<parallel>, #tpu.dimension_semantics<arbitrary>], iteration_bounds = array<i64: 2, 4>, scalar_prefetch = 0 : i64, scratch_operands = 1 : i64, tpu.core_type = #tpu.core_type<tc>, window_params = [{transform_indices = @transform_0, window_bounds = array<i64: 1, 1, 8, 8>}, {transform_indices = @transform_1, window_bounds = array<i64: 3, 1, 8, 8>}, {transform_indices = @transform_2, window_bounds = array<i64: 3, 1, 1, 8>}, {transform_indices = @transform_3, window_bounds = array<i64: 1, 8, 32>}, {pipeline_mode = #tpu.pipeline_mode<synchronous>, transform_indices = @transform_4, window_bounds = array<i64: 1, 32>}, {transform_indices = @transform_5, window_bounds = array<i64: 1, 8, 32>}]} {
    %c0_i32 = arith.constant 0 : i32
    %0 = arith.cmpi eq, %arg1, %c0_i32 : i32
    %1 = arith.extui %0 : i1 to i32
    %c0_i32_0 = arith.constant 0 : i32
    %2 = arith.cmpi ne, %1, %c0_i32_0 : i32
    scf.if %2 {
      %cst_41 = arith.constant 0.000000e+00 : f32
      %52 = vector.broadcast %cst_41 : f32 to vector<8x32xf32>
      %c0_42 = arith.constant 0 : index
      %c0_43 = arith.constant 0 : index
      %53 = vector.load %arg8[%c0_42, %c0_43] : memref<8x32xf32, #tpu.memory_space<vmem>>, vector<8x32xf32>
      tpu.vector_store %arg8[%c0_42, %c0_43], %52 {strides = array<i32>} : memref<8x32xf32, #tpu.memory_space<vmem>>, vector<8x32xf32>,
    } else {
    }
    %c0 = arith.constant 0 : index
    %c0_1 = arith.constant 0 : index
    %c0_2 = arith.constant 0 : index
    %c0_3 = arith.constant 0 : index
    %3 = vector.load %arg2[%c0, %c0_1, %c0_2, %c0_3] : memref<1x1x8x8xbf16, #tpu.memory_space<vmem>>, vector<1x1x8x8xbf16>
    %4 = vector.shape_cast %3 : vector<1x1x8x8xbf16> to vector<8x8xbf16>
    %c0_4 = arith.constant 0 : index
    %c0_5 = arith.constant 0 : index
    %c0_6 = arith.constant 0 : index
    %c0_7 = arith.constant 0 : index
    %5 = vector.load %arg3[%c0_4, %c0_5, %c0_6, %c0_7] : memref<3x1x8x8xbf16, #tpu.memory_space<vmem>>, vector<1x1x8x8xbf16>
    %6 = vector.shape_cast %5 : vector<1x1x8x8xbf16> to vector<8x8xbf16>
    %cst = arith.constant dense<0.000000e+00> : vector<8x8xf32>
    %7 = tpu.matmul %4, %6, %cst {dimension_numbers = #tpu.dot_dimension_numbers<[1], [0], [0], [1], [0, 0, 1, 1], [], []>} : vector<8x8xbf16>, vector<8x8xbf16>, vector<8x8xf32> -> vector<8x8xf32>
    %c0_8 = arith.constant 0 : index
    %c0_9 = arith.constant 0 : index
    %c0_10 = arith.constant 0 : index
    %c0_11 = arith.constant 0 : index
    %8 = vector.load %arg4[%c0_8, %c0_9, %c0_10, %c0_11] : memref<3x1x1x8xf32, #tpu.memory_space<vmem>>, vector<1x1x1x8xf32>
    %9 = vector.shape_cast %8 : vector<1x1x1x8xf32> to vector<1x8xf32>
    %10 = vector.broadcast %9 : vector<1x8xf32> to vector<8x8xf32>
    %11 = arith.addf %7, %10 : vector<8x8xf32>
    %12 = arith.truncf %11 : vector<8x8xf32> to vector<8x8xbf16>
    %c1 = arith.constant 1 : index
    %c0_12 = arith.constant 0 : index
    %c0_13 = arith.constant 0 : index
    %c0_14 = arith.constant 0 : index
    %13 = vector.load %arg3[%c1, %c0_12, %c0_13, %c0_14] : memref<3x1x8x8xbf16, #tpu.memory_space<vmem>>, vector<1x1x8x8xbf16>
    %14 = vector.shape_cast %13 : vector<1x1x8x8xbf16> to vector<8x8xbf16>
    %cst_15 = arith.constant dense<0.000000e+00> : vector<8x8xf32>
    %15 = tpu.matmul %4, %14, %cst_15 {dimension_numbers = #tpu.dot_dimension_numbers<[1], [0], [0], [1], [0, 0, 1, 1], [], []>} : vector<8x8xbf16>, vector<8x8xbf16>, vector<8x8xf32> -> vector<8x8xf32>
    %c1_16 = arith.constant 1 : index
    %c0_17 = arith.constant 0 : index
    %c0_18 = arith.constant 0 : index
    %c0_19 = arith.constant 0 : index
    %16 = vector.load %arg4[%c1_16, %c0_17, %c0_18, %c0_19] : memref<3x1x1x8xf32, #tpu.memory_space<vmem>>, vector<1x1x1x8xf32>
    %17 = vector.shape_cast %16 : vector<1x1x1x8xf32> to vector<1x8xf32>
    %18 = vector.broadcast %17 : vector<1x8xf32> to vector<8x8xf32>
    %19 = arith.addf %15, %18 : vector<8x8xf32>
    %20 = arith.truncf %19 : vector<8x8xf32> to vector<8x8xbf16>
    %c2 = arith.constant 2 : index
    %c0_20 = arith.constant 0 : index
    %c0_21 = arith.constant 0 : index
    %c0_22 = arith.constant 0 : index
    %21 = vector.load %arg3[%c2, %c0_20, %c0_21, %c0_22] : memref<3x1x8x8xbf16, #tpu.memory_space<vmem>>, vector<1x1x8x8xbf16>
    %22 = vector.shape_cast %21 : vector<1x1x8x8xbf16> to vector<8x8xbf16>
    %cst_23 = arith.constant dense<0.000000e+00> : vector<8x8xf32>
    %23 = tpu.matmul %4, %22, %cst_23 {dimension_numbers = #tpu.dot_dimension_numbers<[1], [0], [0], [1], [0, 0, 1, 1], [], []>} : vector<8x8xbf16>, vector<8x8xbf16>, vector<8x8xf32> -> vector<8x8xf32>
    %c2_24 = arith.constant 2 : index
    %c0_25 = arith.constant 0 : index
    %c0_26 = arith.constant 0 : index
    %c0_27 = arith.constant 0 : index
    %24 = vector.load %arg4[%c2_24, %c0_25, %c0_26, %c0_27] : memref<3x1x1x8xf32, #tpu.memory_space<vmem>>, vector<1x1x1x8xf32>
    %25 = vector.shape_cast %24 : vector<1x1x1x8xf32> to vector<1x8xf32>
    %26 = vector.broadcast %25 : vector<1x8xf32> to vector<8x8xf32>
    %27 = arith.addf %23, %26 : vector<8x8xf32>
    %28 = arith.truncf %27 : vector<8x8xf32> to vector<8x8xbf16>
    "tpu.trace_start"() <{level = 10 : i32, message = "qd,kd->qk"}> : () -> ()
    %cst_28 = arith.constant dense<0.000000e+00> : vector<8x8xf32>
    %29 = tpu.matmul %12, %20, %cst_28 {dimension_numbers = #tpu.dot_dimension_numbers<[1], [1], [0], [0], [0, 0, 1, 0], [], []>} : vector<8x8xbf16>, vector<8x8xbf16>, vector<8x8xf32> -> vector<8x8xf32>
    "tpu.trace_stop"() : () -> ()
    %cst_29 = arith.constant dense<0xFF800000> : vector<8xf32>
    %30 = vector.multi_reduction <maximumf>, %29, %cst_29 [1] : vector<8x8xf32> to vector<8xf32>
    %31 = vector.shape_cast %30 : vector<8xf32> to vector<8x1xf32>
    %32 = vector.broadcast %31 : vector<8x1xf32> to vector<8x8xf32>
    %33 = arith.subf %29, %32 : vector<8x8xf32>
    %34 = math.exp %33 : vector<8x8xf32>
    %cst_30 = arith.constant dense<0.000000e+00> : vector<8xf32>
    %35 = vector.multi_reduction <add>, %34, %cst_30 [1] : vector<8x8xf32> to vector<8xf32>
    %36 = vector.shape_cast %35 : vector<8xf32> to vector<8x1xf32>
    %37 = arith.truncf %34 : vector<8x8xf32> to vector<8x8xbf16>
    %cst_31 = arith.constant dense<0.000000e+00> : vector<8x8xf32>
    %38 = tpu.matmul %37, %28, %cst_31 {dimension_numbers = #tpu.dot_dimension_numbers<[1], [0], [0], [1], [0, 0, 1, 1], [], []>} : vector<8x8xbf16>, vector<8x8xbf16>, vector<8x8xf32> -> vector<8x8xf32>
    %39 = tpu.reciprocal %36 {approx = true} : vector<8x1xf32> -> vector<8x1xf32>
    %40 = vector.broadcast %39 : vector<8x1xf32> to vector<8x8xf32>
    %41 = arith.mulf %38, %40 : vector<8x8xf32>
    %c0_32 = arith.constant 0 : index
    %c0_33 = arith.constant 0 : index
    %42 = vector.load %arg8[%c0_32, %c0_33] : memref<8x32xf32, #tpu.memory_space<vmem>>, vector<8x32xf32>
    %43 = arith.truncf %41 : vector<8x8xf32> to vector<8x8xbf16>
    %c0_34 = arith.constant 0 : index
    %c0_35 = arith.constant 0 : index
    %c0_36 = arith.constant 0 : index
    %44 = vector.load %arg5[%c0_34, %c0_35, %c0_36] : memref<1x8x32xbf16, #tpu.memory_space<vmem>>, vector<1x8x32xbf16>
    %45 = vector.shape_cast %44 : vector<1x8x32xbf16> to vector<8x32xbf16>
    %cst_37 = arith.constant dense<0.000000e+00> : vector<8x32xf32>
    %46 = tpu.matmul %43, %45, %cst_37 {dimension_numbers = #tpu.dot_dimension_numbers<[1], [0], [0], [1], [0, 0, 1, 1], [], []>} : vector<8x8xbf16>, vector<8x32xbf16>, vector<8x32xf32> -> vector<8x32xf32>
    %47 = arith.addf %42, %46 : vector<8x32xf32>
    %c0_38 = arith.constant 0 : index
    %c0_39 = arith.constant 0 : index
    %48 = vector.load %arg8[%c0_38, %c0_39] : memref<8x32xf32, #tpu.memory_space<vmem>>, vector<8x32xf32>
    tpu.vector_store %arg8[%c0_38, %c0_39], %47 {strides = array<i32>} : memref<8x32xf32, #tpu.memory_space<vmem>>, vector<8x32xf32>,
    %c3_i32 = arith.constant 3 : i32
    %49 = arith.cmpi eq, %arg1, %c3_i32 : i32
    %50 = arith.extui %49 : i1 to i32
    %c0_i32_40 = arith.constant 0 : i32
    %51 = arith.cmpi ne, %50, %c0_i32_40 : i32
    scf.if %51 {
      %c0_41 = arith.constant 0 : index
      %c0_42 = arith.constant 0 : index
      %52 = vector.load %arg8[%c0_41, %c0_42] : memref<8x32xf32, #tpu.memory_space<vmem>>, vector<8x32xf32>
      %c0_43 = arith.constant 0 : index
      %c0_44 = arith.constant 0 : index
      %53 = vector.load %arg6[%c0_43, %c0_44] : memref<1x32xf32, #tpu.memory_space<vmem>>, vector<1x32xf32>
      %54 = vector.broadcast %53 : vector<1x32xf32> to vector<8x32xf32>
      %55 = arith.addf %52, %54 : vector<8x32xf32>
      %c0_45 = arith.constant 0 : index
      %c0_46 = arith.constant 0 : index
      %c0_47 = arith.constant 0 : index
      %56 = vector.load %arg7[%c0_45, %c0_46, %c0_47] : memref<1x8x32xf32, #tpu.memory_space<vmem>>, vector<1x8x32xf32>
      %57 = vector.shape_cast %56 : vector<1x8x32xf32> to vector<8x32xf32>
      %58 = vector.shape_cast %55 : vector<8x32xf32> to vector<1x8x32xf32>
      tpu.vector_store %arg7[%c0_45, %c0_46, %c0_47], %58 {strides = array<i32>} : memref<1x8x32xf32, #tpu.memory_space<vmem>>, vector<1x8x32xf32>,
    } else {
    }
    return
  }
  func.func @transform_0(%arg0: i32, %arg1: i32) -> (i32, i32, i32, i32) {
    %c0_i32 = arith.constant 0 : i32
    %c0_i32_0 = arith.constant 0 : i32
    %c0_i32_1 = arith.constant 0 : i32
    return %arg0, %arg1, %c0_i32, %c0_i32_0 : i32, i32, i32, i32
  }
  func.func @transform_1(%arg0: i32, %arg1: i32) -> (i32, i32, i32, i32) {
    %c0_i32 = arith.constant 0 : i32
    %c0_i32_0 = arith.constant 0 : i32
    %c0_i32_1 = arith.constant 0 : i32
    %c0_i32_2 = arith.constant 0 : i32
    return %c0_i32, %arg1, %c0_i32_0, %c0_i32_1 : i32, i32, i32, i32
  }
  func.func @transform_2(%arg0: i32, %arg1: i32) -> (i32, i32, i32, i32) {
    %c0_i32 = arith.constant 0 : i32
    %c0_i32_0 = arith.constant 0 : i32
    %c0_i32_1 = arith.constant 0 : i32
    %c0_i32_2 = arith.constant 0 : i32
    return %c0_i32, %arg1, %c0_i32_0, %c0_i32_1 : i32, i32, i32, i32
  }
  func.func @transform_3(%arg0: i32, %arg1: i32) -> (i32, i32, i32) {
    %c0_i32 = arith.constant 0 : i32
    %c0_i32_0 = arith.constant 0 : i32
    %c0_i32_1 = arith.constant 0 : i32
    return %arg1, %c0_i32, %c0_i32_0 : i32, i32, i32
  }
  func.func @transform_4(%arg0: i32, %arg1: i32) -> (i32, i32) {
    %c0_i32 = arith.constant 0 : i32
    %c0_i32_0 = arith.constant 0 : i32
    %c0_i32_1 = arith.constant 0 : i32
    return %c0_i32, %c0_i32_0 : i32, i32
  }
  func.func @transform_5(%arg0: i32, %arg1: i32) -> (i32, i32, i32) {
    %c0_i32 = arith.constant 0 : i32
    %c0_i32_0 = arith.constant 0 : i32
    %c0_i32_1 = arith.constant 0 : i32
    return %arg0, %c0_i32, %c0_i32_0 : i32, i32, i32
  }
}

</mosaic_0001>

<bundles_post_ra>
// kernel: tpu_custom_call.1
= control target key start
LH: loop header
LB: loop body
LE: loop exit
PB: predicated region body
PF: predicated region fallthrough
CT: control target
= control target key end

     0   :  { %s1780_s0 = inlined_call_operand.hbm [shape: bf16[2,4,8,8], index: 0, kind: input, shape index: {}]   ;;  %s1781_s1 = inlined_call_operand.hbm [shape: bf16[3,4,8,8], index: 1, kind: input, shape index: {}]   ;;  %s1782_s2 = inlined_call_operand.hbm [shape: f32[3,4,1,8], index: 2, kind: input, shape index: {}]   ;;  %s1783_s3 = inlined_call_operand.hbm [shape: bf16[4,8,32], index: 3, kind: input, shape index: {}]   ;;  %s1784_s4 = inlined_call_operand.vmem [shape: f32[1,32], index: 4, kind: input, shape index: {}]   ;;  %s1785_s5 = inlined_call_operand.hbm [shape: f32[2,8,32], index: 5, kind: output, shape index: {}]  }
   0x1   :  { %1799 = sst [smem:[#allocation29_spill]] %s1780_s0 }
   0x2   :  { %1800 = sst [smem:[#allocation30_spill]] %s1781_s1 }
   0x3   :  { %1801 = sst [smem:[#allocation31_spill]] %s1784_s4 }
   0x4   :  { %1802 = sst [smem:[#allocation32_spill]] %s1785_s5 }
   0x5   :  { %10 = vsyncpa [#allocation4], 0 }
   0x6   :  { %12 = vsyncpa [#allocation4 + $0x1], 0 }
   0x7   :  { %13 = vsyncpa [#allocation7], 0 }
   0x8   :  { %15 = vsyncpa [#allocation7 + $0x1], 0 }
   0x9   :  { %16 = vsyncpa [#allocation10], 0 }
   0xa   :  { %18 = vsyncpa [#allocation10 + $0x1], 0 }
   0xb   :  { %19 = vsyncpa [#allocation5], 0 }
   0xc   :  { %21 = vsyncpa [#allocation5 + $0x1], 0  ;;  %s1423_s18 = smov 0   ;;  %s1425_s19 = smov 0  }
   0xd   :  { %s1427_s20 = smov 0   ;;  %s1429_s21 = smov 0  }
   0xe   :  { %s1431_s22 = smov 0   ;;  %s1433_s23 = smov 0  }
   0xf   :  { %s1435_s24 = smov 0   ;;  %s1437_s25 = smov 0  }
  0x10   :  { %s1439_s26 = smov 0   ;;  %s1441_s27 = smov 0  }
  0x11   :  { %s1443_s28 = smov 0   ;;  %s1445_s29 = smov 0  }
  0x12   :  { %s1447_s30 = smov 0   ;;  %s1449_s6 = smov 0  }
  0x13 LB: > { %1803 = sst [smem:[#allocation16_spill]] %s1326_s18  ;;  %p56_p0 = scmp.eq.s32.totalorder %s1378_s6, 0  ;;  %s1378_s6 = sphi %s1449_s6, %s27_s6   ;;  %s1374_s30 = sphi %s1447_s30, %s1859_s30   ;;  %s1370_s29 = sphi %s1445_s29, %s1858_s29   ;;  %s1366_s28 = sphi %s1443_s28, %s1857_s28   ;;  %s1362_s27 = sphi %s1441_s27, %s1856_s27   ;;  %s1358_s26 = sphi %s1439_s26, %s1849_s26   ;;  %s1354_s25 = sphi %s1437_s25, %s1848_s25   ;;  %s1350_s24 = sphi %s1435_s24, %s1847_s24   ;;  %s1346_s23 = sphi %s1433_s23, %s1846_s23   ;;  %s1342_s22 = sphi %s1431_s22, %s1855_s22   ;;  %s1338_s21 = sphi %s1429_s21, %s1854_s21   ;;  %s1334_s20 = sphi %s1427_s20, %s1844_s20   ;;  %s1330_s19 = sphi %s1425_s19, %s1853_s19   ;;  %s1326_s18 = sphi %s1423_s18, %s1852_s18  }
  0x14   : > { %1804 = sst [smem:[#allocation17_spill]] %s1334_s20  ;;  %p81_p1 = scmp.ne.s32.totalorder %s1346_s23, %s1342_s22 }
  0x15   : > { %1805 = sst [smem:[#allocation18_spill]] %s1346_s23  ;;  %p988_p2 = scmp.lt.s32.totalorder %s1378_s6, 8 }
  0x16   : > { %1806 = sst [smem:[#allocation19_spill]] %s1354_s25  ;;  %p83_p3 = por %p81_p1, %p56_p0 }
  0x17   : > { %1807 = sst [smem:[#allocation20_spill]] %s1358_s26  ;;  %s233_s7 = sand.u32 1, %s1378_s6  }
  0x18   : > { %1808 = sst [smem:[#allocation21_spill]] %s1362_s27  ;;  %s1501_s8 = sand.u32 1, %s1346_s23  }
  0x19   : > { %1809 = sst [smem:[#allocation22_spill]] %s1366_s28  ;;  %s957_s9 = smul.u32 12, %s1501_s8 }
  0x1a   : > { %s1787_s10 = sshll.u32 %s1370_s29, 6  ;;  %s1810_s1 = sld [smem:[#allocation30_spill]] }
  0x1b   : > { %p1512_p4 = pnand %p988_p2, %p83_p3  ;;  %s237_s15 = scalar_lea.vmem [#allocation6], %s957_s9 }
  0x1c   : > { %s243_s16 = sshll.u32 %s237_s15, 4  ;;  %p885_p5 = scmp.ge.s32.totalorder %s1378_s6, 1  ;;  %s244_s16 = int_to_ptr.vmem [resolvable:$true] %s243_s16 }
  0x1d   : > { %s1517_s17 = scalar_lea.sflag [#allocation7], %s233_s7  ;;  %p1791_p6 = pneg %p1512_p4 }
  0x1e   : > { %s1127_s5 = scalar_lea.vmem %s244_s16, 192  ;;  %s1380_s11 = smov [#allocation6]  }
  0x1f   : > { %p1128_p7 = scmp.ne.s32.totalorder %s244_s16, %s1127_s5  ;;  %s1132_s12 = sshll.u32 %s1380_s11, 4  ;;  %s1133_s12 = int_to_ptr.vmem [resolvable:$false] %s1132_s12 }
  0x20   : > { %s242_s13 = scalar_lea.hbm %s1810_s1, %s1787_s10  ;;  %s1134_s10 = scalar_lea.vmem %s1133_s12, 384 }
  0x21   : > { %p1130_p8 = pnand %p1128_p7, %p1791_p6  ;;  %p1135_p10 = scmp.lt.s32.totalorder %s244_s16, %s1133_s12 }
  0x22   : > { %p1136_p11 = scmp.lt.s32.totalorder %s1134_s10, %s1127_s5 }
  0x23   : > { %p1131_p9 = pneg %p1130_p8 }
  0x24   : > { %p1137_p12 = por %p1136_p11, %p1135_p10 }
  0x26   : > { %p1138_p13 = pnand %p1137_p12, %p1131_p9 }
  0x28   : > { %1141 = shalt.err (!%p1138_p13)
}
  0x29   : > { %s1381_s9 = smov 256   ;;  %s1788_s5 = smov 64  }
  0x2a   : > { %s1383_s7 = smov 4   ;;  %p289_p1 = scmp.lt.s32.totalorder %s1378_s6, 9 }
  0x2b   : > { %977 = dma.hbm_to_vmem [thread:$0]  (!%p1512_p4), %s242_s13, 192, %s244_s16, %s1517_s17, %s1381_s9, %s1788_s5, %s1383_s7  }
  0x2c   : > { %p1531_p3 = pnand %p885_p5, %p289_p1  ;;  %s1536_s15 = sadd.s32 4294967295, %s1378_s6  }
  0x2d   : > { %s36_s12 = sadd.s32 1, %s1370_s29  ;;  %s39_s1 = sadd.s32 1, %s1374_s30 }
  0x2e   : > { %p37_p7 = scmp.ge.s32.totalorder %s36_s12, 4  ;;  %s48_s28 = sadd.s32 1, %s1358_s26 }
  0x2f   : > { %p55_p8 = scmp.ne.s32.totalorder %s1358_s26, %s1354_s25  ;;  %p61_p9 = scmp.ne.s32.totalorder %s1354_s25, %s1350_s24 }
  0x30   : > { %s1861_s12 = smov (%p37_p7, %s36_s12), 0  ;;  %s1863_s1 = smov (!%p37_p7, %s39_s1), %s1374_s30 }
  0x31   : > { %1813 = sst [smem:[#allocation23_spill]] %s1861_s12  ;;  %s44_s13 = ssub.s32 %s1370_s29, %s1861_s12 }
  0x32   : > { %p1553_p5 = por %p56_p0, %p55_p8  ;;  %p41_p10 = scmp.ge.s32.totalorder %s1863_s1, 2 }
  0x33   : > { %p62_p11 = scmp.eq.s32.totalorder %s1536_s15, 0  ;;  %p72_p12 = scmp.eq.s32.totalorder %s44_s13, 0 }
  0x34   : > { %s74_s24 = sadd.s32 1, %s1346_s23  ;;  %s1865_s1 = smov (%p41_p10, %s1863_s1), 0 }
  0x35   : > { %1815 = sst [smem:[#allocation24_spill]] %s1865_s1  ;;  %p1561_p13 = por %p62_p11, %p61_p9 }
  0x36   : > { %p87_p0 = scmp.ne.s32.totalorder %s1342_s22, %s1338_s21  ;;  %s43_s7 = ssub.s32 %s1374_s30, %s1865_s1 }
  0x37   : > { %s173_s5 = sadd.s32 1, %s1334_s20  ;;  %s45_s11 = sor.u32 %s44_s13, %s43_s7 }
  0x38   : > { %p1570_p1 = por %p87_p0, %p62_p11  ;;  %p46_p7 = scmp.eq.s32.totalorder %s45_s11, 0 }
  0x39   : > { %p171_p8 = scmp.eq.s32.totalorder %s43_s7, 0  ;;  %p183_p9 = scmp.ne.s32.totalorder %s1334_s20, %s1330_s19 }
  0x3a   : > { %s1575_s4 = scalar_select %p72_p12, %s1346_s23, %s74_s24  }
  0x3b   : > { %s1578_s27 = scalar_select %p46_p7, %s1358_s26, %s48_s28  }
  0x3c   : > { %1818 = sst [smem:[#allocation25_spill]] %s1575_s4  ;;  %p184_p10 = scmp.eq.s32.totalorder %s1536_s15, 7 }
  0x3d   : > { %1819 = sst [smem:[#allocation26_spill]] %s1578_s27  ;;  %p189_p6 = scmp.ne.s32.totalorder %s1330_s19, %s1326_s18 }
  0x3e   : > { %s1581_s25 = scalar_select %p171_p8, %s1334_s20, %s173_s5  }
  0x3f   : > { %s1821_s21 = sadd.s32 4294967294, %s1378_s6   ;;  %p1590_p0 = por %p184_p10, %p183_p9 }
  0x40   : > { %1820 = sst [smem:[#allocation27_spill]] %s1581_s25  ;;  %p190_p11 = scmp.eq.s32.totalorder %s1821_s21, 7 }
  0x41   : > { %s1822_s13 = scalar_select %p1590_p0, 1, 0 }
  0x42   : > { %s213_s11 = sand.u32 1, %s1358_s26   ;;  %p1595_p12 = por %p190_p11, %p189_p6 }
  0x43   : > { %s878_s28 = sshll.u32 %s213_s11, 2  ;;  %s879_s5 = sshll.u32 %s1374_s30, 2 }
  0x44   : > { %s1823_s24 = scalar_select %p1595_p12, 1, 0 }
  0x45   : > { %s222_s7 = sadd.s32 %s1370_s29, %s879_s5  ;;  %s217_s27 = scalar_lea.vmem [#allocation3], %s878_s28 }
  0x46   : > { %1824 = sst [smem:[#allocation28_spill]] %s1823_s24  ;;  %s880_s1 = sshll.u32 %s222_s7, 6 }
  0x47   : > { %s226_s4 = sshll.u32 %s217_s27, 4  ;;  %s1825_s0 = sld [smem:[#allocation29_spill]]  ;;  %s227_s4 = int_to_ptr.vmem [resolvable:$true] %s226_s4 }
  0x48   : > { %p1608_p7 = pnand %p988_p2, %p1553_p5  ;;  %s958_s26 = smul.u32 3, %s1501_s8 }
  0x49   : > { %s882_s24 = sshll.u32 %s1370_s29, 4  ;;  %s214_s18 = scalar_lea.sflag [#allocation4], %s213_s11 }
  0x4a   : > { %p1144_p6 = pneg %p1608_p7  ;;  %s1155_s5 = scalar_lea.vmem %s227_s4, 64 }
  0x4b   : > { %p1156_p8 = scmp.ne.s32.totalorder %s227_s4, %s1155_s5  ;;  %s1384_s27 = smov [#allocation3]  }
  0x4c   : > { %s1160_s23 = sshll.u32 %s1384_s27, 4  ;;  %s1161_s23 = int_to_ptr.vmem [resolvable:$false] %s1160_s23 }
  0x4d   : > { %s224_s20 = scalar_lea.hbm %s1825_s0, %s880_s1  ;;  %p1158_p9 = pnand %p1156_p8, %p1144_p6 }
  0x4e   : > { %s1162_s1 = scalar_lea.vmem %s1161_s23, 128  ;;  %p1163_p11 = scmp.lt.s32.totalorder %s227_s4, %s1161_s23 }
  0x4f   : > { %p1159_p10 = pneg %p1158_p9  ;;  %p1164_p12 = scmp.lt.s32.totalorder %s1162_s1, %s1155_s5 }
  0x51   : > { %p1165_p2 = por %p1164_p12, %p1163_p11 }
  0x53   : > { %p1166_p5 = pnand %p1165_p2, %p1159_p10 }
  0x55   : > { %1169 = shalt.err (!%p1166_p5)
}
  0x56   : > { %974 = dma.hbm_to_vmem [thread:$0]  (!%p1608_p7), %s224_s20, 64, %s227_s4, %s214_s18  }
  0x57   : > { %s262_s11 = scalar_lea.hbm %s1782_s2, %s882_s24  ;;  %s257_s28 = scalar_lea.vmem [#allocation8], %s958_s26 }
  0x58   : > { %s263_s7 = sshll.u32 %s257_s28, 4  ;;  %p1827_p8 = pneg %p1512_p4  ;;  %s264_s7 = int_to_ptr.vmem [resolvable:$true] %s263_s7 }
  0x59   : > { %s1183_s0 = scalar_lea.vmem %s264_s7, 48  ;;  %s1385_s5 = smov [#allocation8]  }
  0x5a   : > { %p1184_p6 = scmp.ne.s32.totalorder %s264_s7, %s1183_s0  ;;  %s1188_s27 = sshll.u32 %s1385_s5, 4  ;;  %s1189_s27 = int_to_ptr.vmem [resolvable:$false] %s1188_s27 }
  0x5b   : > { %s1190_s23 = scalar_lea.vmem %s1189_s27, 96  ;;  %p1191_p12 = scmp.lt.s32.totalorder %s264_s7, %s1189_s27 }
  0x5c   : > { %p1186_p9 = pnand %p1184_p6, %p1827_p8  ;;  %p1192_p10 = scmp.lt.s32.totalorder %s1190_s23, %s1183_s0 }
  0x5e   : > { %p1187_p0 = pneg %p1186_p9  ;;  %p1193_p7 = por %p1192_p10, %p1191_p12 }
  0x60   : > { %p1194_p11 = pnand %p1193_p7, %p1187_p0 }
  0x62   : > { %1197 = shalt.err (!%p1194_p11)
}
  0x63   : > { %s1386_s4 = smov 16   ;;  %s1387_s18 = smov 1  }
  0x64   : > { %s1828_s20 = smov 64   ;;  %s883_s26 = sshll.u32 %s1501_s8, 2 }
  0x65   : > { %980 = dma.hbm_to_vmem [thread:$0]  (!%p1512_p4), %s262_s11, 48, %s264_s7, %s1517_s17, %s1828_s20, %s1386_s4, %s1387_s18  }
  0x66   : > { %s1829_s24 = sshll.u32 %s1370_s29, 6  ;;  %s277_s25 = scalar_lea.vmem [#allocation9], %s883_s26 }
  0x67   : > { %s282_s0 = scalar_lea.hbm %s1783_s3, %s1829_s24  ;;  %s284_s16 = sshll.u32 %s277_s25, 4  ;;  %s285_s16 = int_to_ptr.vmem [resolvable:$true] %s284_s16 }
  0x68   : > { %s274_s28 = scalar_lea.sflag [#allocation10], %s1501_s8  ;;  %s1211_s5 = scalar_lea.vmem %s285_s16, 64 }
  0x69   : > { %p1212_p0 = scmp.ne.s32.totalorder %s285_s16, %s1211_s5  ;;  %p1830_p2 = pmov %p1827_p8 }
  0x6a   : > { %s1388_s27 = smov [#allocation9]  }
  0x6b   : > { %p1214_p5 = pnand %p1212_p0, %p1830_p2  ;;  %s1216_s23 = sshll.u32 %s1388_s27, 4  ;;  %s1217_s23 = int_to_ptr.vmem [resolvable:$false] %s1216_s23 }
  0x6c   : > { %s1218_s17 = scalar_lea.vmem %s1217_s23, 128  ;;  %p1219_p8 = scmp.lt.s32.totalorder %s285_s16, %s1217_s23 }
  0x6d   : > { %p1215_p6 = pneg %p1214_p5  ;;  %p1220_p9 = scmp.lt.s32.totalorder %s1218_s17, %s1211_s5 }
  0x6f   : > { %p1221_p12 = por %p1220_p9, %p1219_p8 }
  0x71   : > { %p1222_p10 = pnand %p1221_p12, %p1215_p6 }
  0x73   : > { %1225 = shalt.err (!%p1222_p10)
}
  0x74   : > { %983 = dma.hbm_to_vmem [thread:$0]  (!%p1512_p4), %s282_s0, 64, %s285_s16, %s274_s28  }
  0x75   : > { %293 = sbr.rel (%p1531_p3) target bundleno = 1142 (0x476), region = 40  ;;  %s1831_s8 = sld [smem:[#allocation19_spill]] (!%p1531_p3) }
  0x7b   : > { %s295_s11 = sand.u32 1, %s1831_s8  }
  0x7c   : > { %s1643_s7 = sshll.u32 %s295_s11, 2  ;;  %s296_s4 = scalar_lea.sflag [#allocation4], %s295_s11 }
  0x7d   : > { %s299_s18 = scalar_lea.vmem [#allocation3], %s1643_s7 }
  0x7e   : > { %1309 = dma.done.wait (%p1561_p13), %s296_s4, 64  }
  0x7f   : > { %1311 = vsyncadd (%p1561_p13), %s296_s4, 4294967232  ;;  %s304_s14 = sand.u32 1, %s1536_s15   ;;  %s306_s20 = sand.u32 1, %s1342_s22  }
  0x80   : > { %s959_s10 = smul.u32 12, %s306_s20  ;;  %s305_s26 = scalar_lea.sflag [#allocation7], %s304_s14 }
  0x82   : > { %s1652_s24 = scalar_lea.vmem [#allocation6], %s959_s10 }
  0x83   : > { %1313 = dma.done.wait (%p1570_p1), %s305_s26, 240  }
  0x84   : > { %1315 = vsyncadd (%p1570_p1), %s305_s26, 4294967056  ;;  %s960_s21 = smul.u32 3, %s306_s20  ;;  %s887_s1 = sshll.u32 %s306_s20, 2 }
  0x85   : > { %s323_s9 = scalar_lea.sflag [#allocation10], %s306_s20  ;;  %s1660_s25 = scalar_lea.vmem [#allocation9], %s887_s1 }
  0x86   : > { %s1658_s0 = scalar_lea.vmem [#allocation8], %s960_s21 }
  0x87   : > { %1317 = dma.done.wait (%p1570_p1), %s323_s9, 64  }
  0x88   : > { %1319 = vsyncadd (%p1570_p1), %s323_s9, 4294967232  ;;  %s365_s15 = sand.u32 1, %s1330_s19   ;;  %s1832_s5 = sld [smem:[#allocation21_spill]] }
  0x89   : > { %s1669_s16 = sshll.u32 %s365_s15, 3 }
  0x8a   : > { %s367_s28 = scalar_lea.vmem [#allocation11], %s1669_s16 }
  0x8e   : > { %p889_p4 = scmp.ne.s32.totalorder %s1832_s5, 0 }
  0x90   : > { %372 = sbr.rel (%p889_p4) target bundleno = 151 (0x97), region = 60 }
  0x95   : > { %vm373_vm0 = vcmask 261120   ;;  %v1389_v0 = vmov 0.0  }
  0x96   : > { %374 = vst.msk [vmem:[#allocation2] sm:$0xff] %vm373_vm0, %v1389_v0 }
  0x97 PF: > { %vm388_vm1 = vcmask 1043456   ;;  %v892_v1 = vld [vmem:[%s1652_s24 + $0x4] sm:$0xf]  ;;  %v1390_v2 = vmov 0.0   ;;  %v376_v4 = vld [vmem:[%s1652_s24] sm:$0xf] }
  0x98   : > { %927 = vmatprep.subr.bf16.mxu1 %v1390_v2  ;;  %v444_v3 = vsel %vm388_vm1, %v892_v1, 0  ;;  %921 = vmatprep.subr.bf16.mxu0 %v1390_v2  ;;  %vm1391_vm2 = vmmov 0   ;;  %v390_v5 = vsel %vm388_vm1, %v376_v4, 0  ;;  %v375_v6 = vld [vmem:[%s299_s18] sm:$0xf]  ;;  %vm384_vm3 = vcmask 64512  }
  0x99   : > { %928 = vmatpush3.bf16.msra.mxu1 %v444_v3  ;;  %929 = vmatprep.mubr.msk.bf16.mxu1 %vm1391_vm2, %v1390_v2  ;;  %v896_v7 = vld [vmem:[%s1652_s24 + $0x8] sm:$0xf]  ;;  %v894_v9 = vld [vmem:[%s1658_s0 + $0x1] ss:$0 sm:$0xff]  ;;  %v890_v14 = vld [vmem:[%s1658_s0] ss:$0 sm:$0xff] }
  0x9a   : > { %922 = vmatpush3.bf16.msra.mxu0 %v390_v5  ;;  %923 = vmatprep.mubr.msk.bf16.mxu0 %vm1391_vm2, %v1390_v2  ;;  %v498_v8 = vsel %vm388_vm1, %v896_v7, 0  ;;  %v898_v29 = vld [vmem:[%s1658_s0 + $0x2] ss:$0 sm:$0xff]  ;;  %v647_v43 = vld [vmem:[%s1660_s25] sm:$0xf]  ;;  %vm695_vm4 = vcmask 261120  }
  0x9b   : > { %939 = vmatprep.subr.bf16.mxu1 %v1390_v2  ;;  %933 = vmatprep.subr.bf16.mxu0 %v1390_v2  ;;  %v652_v44 = vsel %vm388_vm1, %v647_v43, 0  ;;  %s1833_s12 = sld [smem:[#allocation21_spill]] }
  0x9c   : > { %930 = vmatmul.mubr.msk.bf16.vlgmr.msra.gmra.mxu1 %vm384_vm3, %v375_v6 }
  0x9d   : > { %924 = vmatmul.mubr.msk.bf16.vlgmr.msra.gmra.mxu0 %vm384_vm3, %v375_v6  ;;  %941 = vmatprep.mubr.msk.bf16.mxu1 %vm1391_vm2, %v1390_v2  ;;  %v645_v53 = vld [vmem:[#allocation2] sm:$0xff] }
  0x9e   : > { %935 = vmatprep.mubr.msk.bf16.mxu0 %vm1391_vm2, %v1390_v2  ;;  %934 = vmatpush3.bf16.msra.mxu0 %v498_v8 }
  0x9f   : > { %945 = vmatprep.subr.bf16.mxu0 %v1390_v2 }
  0xa1   : > { %p903_p3 = scmp.ne.s32.totalorder %s1833_s12, 3 }
  0xa2   : > { %s1834_s17 = sld [smem:[#allocation31_spill]] (!%p903_p3) }
  0xa5   : > { %936 = vmatmul.mubr.msk.bf16.vlgmr.msra.gmra.mxu0 %vm384_vm3, %v375_v6 }
  0xa6   : > { %947 = vmatprep.mubr.msk.bf16.mxu0 %vm1391_vm2, %v1390_v2 }
 0x15c   : > { %v480_v10 = vpop.f32.mrf.mxu1 }
 0x15d   : > { %v481_v11 = vadd.f32 %v894_v9, %v480_v10  ;;  %v426_v12 = vpop.f32.mrf.mxu0 }
 0x15e   : > { %v931_v13 = vpop.f32.mrf.mxu1  ;;  %v427_v19 = vadd.f32 %v890_v14, %v426_v12 }
 0x15f   : > { %v486_v15 = vpack.c.bf16 %v481_v11, %v481_v11  ;;  %v925_v16 = vpop.f32.mrf.mxu0 }
 0x160   : > { %v483_v17 = vpop.f32.mrf.mxu1  ;;  %v432_v23 = vpack.c.bf16 %v427_v19, %v427_v19 }
 0x161   : > { %v545_v18 = vsel %vm384_vm3, %v486_v15, 0  ;;  %v429_v20 = vpop.f32.mrf.mxu0 }
 0x162   : > { %v932_v21 = vpop.f32.mrf.mxu1  ;;  %940 = vmatpush3.bf16.xpose.msra.mxu1 %v545_v18 }
 0x163   : > { %v926_v22 = vpop.f32.mrf.mxu0  ;;  %951 = vmatprep.subr.bf16.mxu1 %v1390_v2 }
 0x165   : > { %v534_v30 = vpop.f32.mrf.mxu0 }
 0x166   : > { %v535_v31 = vadd.f32 %v898_v29, %v534_v30 }
 0x167   : > { %v937_v32 = vpop.f32.mrf.mxu0 }
 0x168   : > { %v540_v33 = vpack.c.bf16 %v535_v31, %v535_v31 }
 0x169   : > { %942 = vmatmul.mubr.msk.bf16.vlgmr.msra.gmra.mxu1 %vm384_vm3, %v432_v23  ;;  %v537_v34 = vpop.f32.mrf.mxu0 }
 0x16a   : > { %953 = vmatprep.mubr.msk.bf16.mxu1 %vm1391_vm2, %v1390_v2  ;;  %v601_v35 = vsel %vm388_vm1, %v540_v33, 0  ;;  %952 = vmatpush3.bf16.msra.mxu1 %v652_v44 }
 0x16b   : > { %v938_v36 = vpop.f32.mrf.mxu0  ;;  %946 = vmatpush3.bf16.msra.mxu0 %v601_v35 }
 0x229   : > { %v581_v24 = vpop.f32.mrf.mxu1 }
 0x22a   : > { %v587_v25 = vsel %vm384_vm3, %v581_v24, -inf }
 0x22b   : > { %588 = vmax.xlane.f32.xlu0 %v587_v25  ;;  %v943_v26 = vpop.f32.mrf.mxu1 }
 0x22d   : > { %v584_v27 = vpop.f32.mrf.mxu1 }
 0x22f   : > { %v944_v28 = vpop.f32.mrf.mxu1 }
 0x2b4   : > { %v589_v37 = vpop.xlane.xlu0 %588 }
 0x2b5   : > { %v590_v38 = vsub.f32 %v581_v24, %v589_v37 }
 0x2b7   : > { %v591_v39 = vmul.f32 1.442695, %v590_v38 }
 0x2b9   : > { %1110 = vpow2.f32 %v591_v39 }
 0x2c6   : > { %v1111_v40 = vpop.eup %1110 }
 0x2c7   : > { %v593_v41 = vsel %vm384_vm3, %v1111_v40, 0.0  ;;  %v596_v42 = vpack.c.bf16 %v1111_v40, %v1111_v40 }
 0x2c8   : > { %594 = vadd.xlane.f32.xlu0 %v593_v41 }
 0x2c9   : > { %948 = vmatmul.mubr.msk.bf16.vlgmr.msra.gmra.mxu0 %vm384_vm3, %v596_v42 }
 0x351   : > { %v595_v45 = vpop.xlane.xlu0 %594 }
 0x352   : > { %1112 = vrcp.f32 %v595_v45 }
 0x35f   : > { %v1113_v46 = vpop.eup %1112 }
 0x389   : > { %v637_v47 = vpop.f32.mrf.mxu0 }
 0x38a   : > { %v644_v48 = vmul.f32 %v1113_v46, %v637_v47 }
 0x38b   : > { %v949_v49 = vpop.f32.mrf.mxu0 }
 0x38c   : > { %v646_v50 = vpack.c.bf16 %v644_v48, %v644_v48 }
 0x38d   : > { %v640_v51 = vpop.f32.mrf.mxu0 }
 0x38e   : > { %954 = vmatmul.mubr.msk.bf16.vlgmr.msra.gmra.mxu1 %vm384_vm3, %v646_v50 }
 0x38f   : > { %v950_v52 = vpop.f32.mrf.mxu0 }
 0x44e   : > { %v688_v54 = vpop.f32.mrf.mxu1 }
 0x44f   : > { %v694_v55 = vadd.f32 %v688_v54, %v645_v53 }
 0x450   : > { %v955_v56 = vpop.f32.mrf.mxu1  ;;  %700 = sbr.rel (%p903_p3) target bundleno = 1116 (0x45c), region = 64 }
 0x451   : > { %696 = vst.msk [vmem:[#allocation2] sm:$0xff] %vm695_vm4, %v694_v55 }
 0x452   : > { %v691_v57 = vpop.f32.mrf.mxu1 }
 0x454   : > { %v956_v58 = vpop.f32.mrf.mxu1 }
 0x455   : > { %v904_v60 = vld [vmem:[%s1834_s17] ss:$0 sm:$0xff] }
 0x458   : > { %v701_v59 = vld [vmem:[#allocation2] sm:$0xff] }
 0x459   : > { %v709_v61 = vadd.f32 %v904_v60, %v701_v59 }
 0x45b   : > { %710 = vst.msk [vmem:[%s367_s28] sm:$0xff] %vm695_vm4, %v709_v61 }
 0x45c PF: > { %s1835_s8 = sld [smem:[#allocation22_spill]]  ;;  %s725_s10 = sshll.u32 %s367_s28, 4  ;;  %s726_s10 = int_to_ptr.vmem [resolvable:$true] %s725_s10 }
 0x45d   : > { %s1836_s18 = sld [smem:[#allocation32_spill]]  ;;  %s712_s26 = scalar_lea.sflag [#allocation5], %s365_s15 }
 0x45e   : > { %s1226_s24 = scalar_lea.vmem %s726_s10, 128  ;;  %p1838_p1 = scmp.ne.s32.totalorder %s1822_s13, 0 }
 0x45f   : > { %p1227_p13 = scmp.ne.s32.totalorder %s726_s10, %s1226_s24  ;;  %s1392_s21 = smov [#allocation11]  }
 0x460   : > { %s1230_s1 = sshll.u32 %s1392_s21, 4  ;;  %s1231_s1 = int_to_ptr.vmem [resolvable:$false] %s1230_s1 }
 0x461   : > { %p1228_p7 = pnand %p1227_p13, %p1838_p1  ;;  %s1232_s0 = scalar_lea.vmem %s1231_s1, 256 }
 0x462   : > { %s906_s11 = sshll.u32 %s1835_s8, 7  ;;  %p1233_p0 = scmp.lt.s32.totalorder %s726_s10, %s1231_s1 }
 0x463   : > { %s1837_s14 = smov %s1836_s18  ;;  %s723_s20 = scalar_lea.hbm %s1836_s18, %s906_s11 }
 0x464   : > { %p1229_p11 = pneg %p1228_p7  ;;  %p1234_p2 = scmp.lt.s32.totalorder %s1232_s0, %s1226_s24 }
 0x466   : > { %p1235_p5 = por %p1234_p2, %p1233_p0 }
 0x468   : > { %p1236_p6 = pnand %p1235_p5, %p1229_p11 }
 0x46a   : > { %1239 = shalt.err (!%p1236_p6)
}
 0x46b   : > { %s1240_s9 = scalar_lea.hbm %s723_s20, 128  ;;  %s1244_s16 = scalar_lea.hbm %s1837_s14, 256 }
 0x46c   : > { %p1241_p8 = scmp.ne.s32.totalorder %s723_s20, %s1240_s9  ;;  %p1245_p10 = scmp.lt.s32.totalorder %s723_s20, %s1837_s14 }
 0x46d   : > { %p1246_p4 = scmp.lt.s32.totalorder %s1244_s16, %s1240_s9 }
 0x46e   : > { %p1242_p9 = pnand %p1241_p8, %p1838_p1 }
 0x46f   : > { %p1247_p3 = por %p1246_p4, %p1245_p10 }
 0x470   : > { %p1243_p12 = pneg %p1242_p9 }
 0x472   : > { %p1248_p13 = pnand %p1247_p3, %p1243_p12 }
 0x474   : > { %1251 = shalt.err (!%p1248_p13)
}
 0x475   : > { %969 = dma.vmem_to_hbm [thread:$0]  (%p1838_p1), %s726_s10, 128, %s723_s20, %s712_s26  }
 0x476 PF: > { %s1839_s12 = sld [smem:[#allocation16_spill]]  ;;  %p989_p7 = scmp.ge.s32.totalorder %s1378_s6, 2 }
 0x477   : > { %s1840_s27 = sld [smem:[#allocation28_spill]] }
 0x47c   : > { %s737_s23 = sand.u32 1, %s1839_s12  }
 0x47d   : > { %p1841_p11 = scmp.ne.s32.totalorder %s1840_s27, 0  ;;  %s738_s17 = scalar_lea.sflag [#allocation5], %s737_s23 }
 0x47f   : > { %p985_p0 = pnand %p989_p7, %p1841_p11 }
 0x481   : > { %p986_p2 = pneg %p985_p0 }
 0x483   : > { %1321 = dma.done.wait (%p986_p2), %s738_s17, 128  }
 0x484   : > { %1323 = vsyncadd (%p986_p2), %s738_s17, 4294967168  ;;  %s27_s6 = sadd.s32 1, %s1378_s6   ;;  %s1843_s13 = sld [smem:[#allocation17_spill]] }
 0x485   : > { %p1733_p5 = scmp.ge.s32.totalorder %s27_s6, 10   ;;  %s1844_s20 = sld [smem:[#allocation27_spill]] }
 0x486   : > { %s1845_s11 = sld [smem:[#allocation18_spill]]  ;;  %s1852_s18 = smov %s1330_s19 }
 0x487   : > { %s1846_s23 = sld [smem:[#allocation25_spill]]  ;;  %s1854_s21 = smov %s1342_s22 }
 0x488   : > { %s1847_s24 = sld [smem:[#allocation19_spill]]  ;;  %s1856_s27 = smov %s1370_s29 }
 0x489   : > { %s1848_s25 = sld [smem:[#allocation20_spill]]  ;;  %s1857_s28 = smov %s1374_s30 }
 0x48a   : > { %s1849_s26 = sld [smem:[#allocation26_spill]]  ;;  %s1853_s19 = smov %s1843_s13 }
 0x48b   : > { %s1850_s7 = sld [smem:[#allocation23_spill]] }
 0x48c   : > { %s1851_s4 = sld [smem:[#allocation24_spill]]  ;;  %s1855_s22 = smov %s1845_s11 }
 0x48e   :  { %26 = sbr.rel (!%p1733_p5) target bundleno = 19 (0x13), region = 134 }
 0x491   : > { %s1858_s29 = smov %s1850_s7 }
 0x492   : > { %s1859_s30 = smov %s1851_s4 }
 0x493   :  { %743 = vsyncpa [#allocation4], 1 }
 0x494   :  { %745 = vsyncpa [#allocation4 + $0x1], 1 }
 0x495   :  { %746 = vsyncpa [#allocation7], 1 }
 0x496   :  { %748 = vsyncpa [#allocation7 + $0x1], 1 }
 0x497   :  { %749 = vsyncpa [#allocation10], 1 }
 0x498   :  { %751 = vsyncpa [#allocation10 + $0x1], 1 }
 0x499   :  { %752 = vsyncpa [#allocation5], 1 }
 0x49a   :  { %754 = vsyncpa [#allocation5 + $0x1], 1 }

</bundles_post_ra>
